<compile_context>
chip_gen: v6e
topology: v6e:2x2x1
jax: 0.10.0
libtpu: 0.0.40
codegen_flags: <defaults>
</compile_context>

<pallas_src>
import jax
import jax.numpy as jnp
from jax.experimental import pallas as pl
from jax.experimental.pallas import tpu as pltpu


def _residual_linear_kernel(x_ref, w_ref, b_ref, o_ref):
    # x_ref: [tm, H]   (original dtype, full K for the matmul + residual source)
    # w_ref: [H, tn]   (bf16 by default), b_ref: [1, tn] (f32), o_ref: [tm, tn]
    tn = o_ref.shape[-1]
    j = pl.program_id(1)

    # MXU: low-precision operands, f32 accumulate.
    y = jnp.dot(x_ref[...].astype(w_ref.dtype), w_ref[...],
                preferred_element_type=jnp.float32)
    y = y + b_ref[...].astype(jnp.float32)

    # Residual add (identity shortcut): columns of x matching this N tile,
    # taken from the original (uncast) x. f32 epilogue, cast on store.
    col = pl.multiple_of(j * tn, tn)
    x_res = x_ref[:, pl.ds(col, tn)]
    o_ref[...] = (y + x_res.astype(jnp.float32)).astype(o_ref.dtype)


def _make_call(M, H, tm, tn, num_m, num_n, out_dtype, single_buffer_resident,
               vmem_limit_bytes, cost):
    resident_kwargs = (
        dict(pipeline_mode=pl.Buffered(buffer_count=1))
        if single_buffer_resident else {}
    )
    grid_spec = pltpu.PrefetchScalarGridSpec(
        num_scalar_prefetch=0,
        grid=(num_m, num_n),
        in_specs=[
            # x tile: full hidden (K) per M tile; constant across the inner N
            # loop, so it is fetched once per M tile.
            pl.BlockSpec((tm, H), lambda i, j: (i, 0)),
            # Weight column slab (resident across M tiles when num_n == 1).
            pl.BlockSpec((H, tn), lambda i, j: (0, j), **resident_kwargs),
            # Bias slab (f32, resident).
            pl.BlockSpec((1, tn), lambda i, j: (0, j), **resident_kwargs),
        ],
        out_specs=pl.BlockSpec((tm, tn), lambda i, j: (i, j)),
    )
    return pl.pallas_call(
        _residual_linear_kernel,
        out_shape=jax.ShapeDtypeStruct((M, H), out_dtype),
        grid_spec=grid_spec,
        compiler_params=pltpu.CompilerParams(
            dimension_semantics=("parallel", "parallel"),
            vmem_limit_bytes=vmem_limit_bytes,
        ),
        cost_estimate=cost,
    )


def _pick_tn(H):
    # Keep W fully resident for small/medium H; otherwise tile N with a
    # 128-multiple that divides H (matches MXU tile, lane-dense output).
    if H <= 2048:
        return H
    for cand in (2048, 1024, 512, 256, 128):
        if H % cand == 0:
            return cand
    return H


def residual_add(x, w, b, *, tm=None, tn=None, mxu_dtype=jnp.bfloat16):
    """out = (x @ w + b) + x, fused in one Pallas kernel.

    x: [B, S, H], w: [H, H], b: [H].  `mxu_dtype` is the matmul-operand dtype
    (default bf16; accumulation is always f32).  Pass mxu_dtype=None to keep
    the input dtype on the MXU.
    """
    B, S, H = x.shape
    M = B * S
    out_dtype = x.dtype

    x2d = x.reshape(M, H)
    w_c = w if mxu_dtype is None else w.astype(mxu_dtype)
    b2d = b.reshape(1, H).astype(jnp.float32)   # epilogue stays f32

    # ---- tile sizes -------------------------------------------------------
    if tm is None:
        tm = min(512, M)
    tm = min(tm, M)
    if tm != M:
        tm = max(8, (tm // 8) * 8)              # sublane-aligned when tiling
    if tn is None:
        tn = _pick_tn(H)
    tn = min(tn, H)
    if H % tn != 0:
        tn = H                                  # avoid ragged N blocks

    num_m = pl.cdiv(M, tm)                      # ragged trailing M block is OK
    num_n = H // tn
    single_buffer = num_n == 1                  # constant index_map -> 1 buffer

    # ---- VMEM budget (per-TC) --------------------------------------------
    x_item = jnp.dtype(x2d.dtype).itemsize
    w_item = jnp.dtype(w_c.dtype).itemsize
    o_item = jnp.dtype(out_dtype).itemsize
    w_bufs = 1 if single_buffer else 2
    vmem_need = (2 * tm * H * x_item            # double-buffered x tiles
                 + 2 * tm * tn * o_item         # double-buffered out tiles
                 + w_bufs * H * tn * w_item     # weight slab
                 + 2 * tn * 4                   # bias
                 + (2 << 20))                   # Mosaic scratch slack
    vmem_limit = int(min(max(vmem_need * 5 // 4, 32 << 20), 100 << 20))

    # ---- cost estimate (actual dtypes, unpadded M) -------------------------
    w_reads = 1 if single_buffer else num_m
    cost = pl.CostEstimate(
        flops=2 * M * H * H + 2 * M * H,
        transcendentals=0,
        bytes_accessed=int(M * H * x_item + M * H * o_item
                           + w_reads * H * H * w_item + w_reads * H * 4),
    )

    # ---- launch ------------------------------------------------------------
    args = (M, H, tm, tn, num_m, num_n, out_dtype)
    if single_buffer:
        try:
            out2d = _make_call(*args, True, vmem_limit, cost)(x2d, w_c, b2d)
        except Exception:
            # pl.Buffered(1) unsupported in this build: fall back to default
            # double-buffering of the resident W/bias blocks.
            out2d = _make_call(*args, False, vmem_limit, cost)(x2d, w_c, b2d)
    else:
        out2d = _make_call(*args, False, vmem_limit, cost)(x2d, w_c, b2d)

    return out2d.reshape(B, S, H)


if __name__ == "__main__":
    key = jax.random.PRNGKey(0)
    k_x, k_w, k_b = jax.random.split(key, 3)

    # H is a multiple of 128 (lane-dense output blocks); S=9 makes M=18, which
    # with tm=8 exercises the ragged trailing M block (no wrapper pad/slice).
    B, S, H = 2, 9, 128
    x = jax.random.normal(k_x, (B, S, H), dtype=jnp.float32)
    # Deterministic synthetic Linear(H, H) parameters (block); shortcut=None.
    w = jax.random.normal(k_w, (H, H), dtype=jnp.float32) * 0.05
    b = jax.random.normal(k_b, (H,), dtype=jnp.float32) * 0.01

    out = residual_add(x, w, b, tm=8)
    jax.block_until_ready(out)

    # Reference in plain JAX (f32). bf16 MXU operands + f32 accumulate ->
    # loosened tolerance vs. the all-f32 reference.
    ref = (x @ w + b) + x
    assert out.shape == (B, S, H)
    assert jnp.allclose(out, ref, atol=3e-2, rtol=3e-2), float(
        jnp.max(jnp.abs(out - ref)))

    print("KERNEL_OK")
</pallas_src>

<mosaic_0001>
module attributes {stable_mosaic.version = 11 : i64} {
  func.func @_residual_linear_kernel(%arg0: i32, %arg1: i32, %arg2: memref<8x128xf32, #tpu.memory_space<vmem>>, %arg3: memref<128x128xbf16, #tpu.memory_space<vmem>>, %arg4: memref<1x128xf32, #tpu.memory_space<vmem>>, %arg5: memref<8x128xf32, #tpu.memory_space<vmem>>) attributes {dimension_semantics = [#tpu.dimension_semantics<parallel>, #tpu.dimension_semantics<parallel>], iteration_bounds = array<i64: 3, 1>, scalar_prefetch = 0 : i64, scratch_operands = 0 : i64, tpu.core_type = #tpu.core_type<tc>, window_params = [{transform_indices = @transform_0, window_bounds = array<i64: 8, 128>}, {pipeline_mode = #tpu.pipeline_mode<synchronous>, transform_indices = @transform_1, window_bounds = array<i64: 128, 128>}, {pipeline_mode = #tpu.pipeline_mode<synchronous>, transform_indices = @transform_2, window_bounds = array<i64: 1, 128>}, {transform_indices = @transform_3, window_bounds = array<i64: 8, 128>}]} {
    %c0 = arith.constant 0 : index
    %c0_0 = arith.constant 0 : index
    %0 = vector.load %arg2[%c0, %c0_0] : memref<8x128xf32, #tpu.memory_space<vmem>>, vector<8x128xf32>
    %1 = arith.truncf %0 : vector<8x128xf32> to vector<8x128xbf16>
    %c0_1 = arith.constant 0 : index
    %c0_2 = arith.constant 0 : index
    %2 = vector.load %arg3[%c0_1, %c0_2] : memref<128x128xbf16, #tpu.memory_space<vmem>>, vector<128x128xbf16>
    %cst = arith.constant dense<0.000000e+00> : vector<8x128xf32>
    %3 = tpu.matmul %1, %2, %cst {dimension_numbers = #tpu.dot_dimension_numbers<[1], [0], [0], [1], [0, 0, 1, 1], [], []>} : vector<8x128xbf16>, vector<128x128xbf16>, vector<8x128xf32> -> vector<8x128xf32>
    %c0_3 = arith.constant 0 : index
    %c0_4 = arith.constant 0 : index
    %4 = vector.load %arg4[%c0_3, %c0_4] : memref<1x128xf32, #tpu.memory_space<vmem>>, vector<1x128xf32>
    %5 = vector.broadcast %4 : vector<1x128xf32> to vector<8x128xf32>
    %6 = arith.addf %3, %5 : vector<8x128xf32>
    %c128_i32 = arith.constant 128 : i32
    %7 = arith.muli %arg1, %c128_i32 : i32
    %8 = tpu.assume_multiple %7, 128 : i32
    %c0_5 = arith.constant 0 : index
    %9 = arith.index_cast %8 : i32 to index
    %10 = vector.load %arg2[%c0_5, %9] : memref<8x128xf32, #tpu.memory_space<vmem>>, vector<8x128xf32>
    %11 = arith.addf %6, %10 : vector<8x128xf32>
    %c0_6 = arith.constant 0 : index
    %c0_7 = arith.constant 0 : index
    %12 = vector.load %arg5[%c0_6, %c0_7] : memref<8x128xf32, #tpu.memory_space<vmem>>, vector<8x128xf32>
    tpu.vector_store %arg5[%c0_6, %c0_7], %11 {strides = array<i32>} : memref<8x128xf32, #tpu.memory_space<vmem>>, vector<8x128xf32>,
    return
  }
  func.func @transform_0(%arg0: i32, %arg1: i32) -> (i32, i32) {
    %c0_i32 = arith.constant 0 : i32
    %c0_i32_0 = arith.constant 0 : i32
    return %arg0, %c0_i32 : i32, i32
  }
  func.func @transform_1(%arg0: i32, %arg1: i32) -> (i32, i32) {
    %c0_i32 = arith.constant 0 : i32
    %c0_i32_0 = arith.constant 0 : i32
    return %c0_i32, %arg1 : i32, i32
  }
  func.func @transform_2(%arg0: i32, %arg1: i32) -> (i32, i32) {
    %c0_i32 = arith.constant 0 : i32
    %c0_i32_0 = arith.constant 0 : i32
    return %c0_i32, %arg1 : i32, i32
  }
  func.func @transform_3(%arg0: i32, %arg1: i32) -> (i32, i32) {
    %c0_i32 = arith.constant 0 : i32
    return %arg0, %arg1 : i32, i32
  }
}

module attributes {stable_mosaic.version = 11 : i64} {
  func.func @_residual_linear_kernel(%arg0: i32, %arg1: i32, %arg2: memref<8x128xf32, #tpu.memory_space<vmem>>, %arg3: memref<128x128xbf16, #tpu.memory_space<vmem>>, %arg4: memref<1x128xf32, #tpu.memory_space<vmem>>, %arg5: memref<8x128xf32, #tpu.memory_space<vmem>>) attributes {dimension_semantics = [#tpu.dimension_semantics<parallel>, #tpu.dimension_semantics<parallel>], iteration_bounds = array<i64: 3, 1>, scalar_prefetch = 0 : i64, scratch_operands = 0 : i64, tpu.core_type = #tpu.core_type<tc>, window_params = [{transform_indices = @transform_0, window_bounds = array<i64: 8, 128>}, {transform_indices = @transform_1, window_bounds = array<i64: 128, 128>}, {transform_indices = @transform_2, window_bounds = array<i64: 1, 128>}, {transform_indices = @transform_3, window_bounds = array<i64: 8, 128>}]} {
    %c0 = arith.constant 0 : index
    %c0_0 = arith.constant 0 : index
    %0 = vector.load %arg2[%c0, %c0_0] : memref<8x128xf32, #tpu.memory_space<vmem>>, vector<8x128xf32>
    %1 = arith.truncf %0 : vector<8x128xf32> to vector<8x128xbf16>
    %c0_1 = arith.constant 0 : index
    %c0_2 = arith.constant 0 : index
    %2 = vector.load %arg3[%c0_1, %c0_2] : memref<128x128xbf16, #tpu.memory_space<vmem>>, vector<128x128xbf16>
    %cst = arith.constant dense<0.000000e+00> : vector<8x128xf32>
    %3 = tpu.matmul %1, %2, %cst {dimension_numbers = #tpu.dot_dimension_numbers<[1], [0], [0], [1], [0, 0, 1, 1], [], []>} : vector<8x128xbf16>, vector<128x128xbf16>, vector<8x128xf32> -> vector<8x128xf32>
    %c0_3 = arith.constant 0 : index
    %c0_4 = arith.constant 0 : index
    %4 = vector.load %arg4[%c0_3, %c0_4] : memref<1x128xf32, #tpu.memory_space<vmem>>, vector<1x128xf32>
    %5 = vector.broadcast %4 : vector<1x128xf32> to vector<8x128xf32>
    %6 = arith.addf %3, %5 : vector<8x128xf32>
    %c128_i32 = arith.constant 128 : i32
    %7 = arith.muli %arg1, %c128_i32 : i32
    %8 = tpu.assume_multiple %7, 128 : i32
    %c0_5 = arith.constant 0 : index
    %9 = arith.index_cast %8 : i32 to index
    %10 = vector.load %arg2[%c0_5, %9] : memref<8x128xf32, #tpu.memory_space<vmem>>, vector<8x128xf32>
    %11 = arith.addf %6, %10 : vector<8x128xf32>
    %c0_6 = arith.constant 0 : index
    %c0_7 = arith.constant 0 : index
    %12 = vector.load %arg5[%c0_6, %c0_7] : memref<8x128xf32, #tpu.memory_space<vmem>>, vector<8x128xf32>
    tpu.vector_store %arg5[%c0_6, %c0_7], %11 {strides = array<i32>} : memref<8x128xf32, #tpu.memory_space<vmem>>, vector<8x128xf32>,
    return
  }
  func.func @transform_0(%arg0: i32, %arg1: i32) -> (i32, i32) {
    %c0_i32 = arith.constant 0 : i32
    %c0_i32_0 = arith.constant 0 : i32
    return %arg0, %c0_i32 : i32, i32
  }
  func.func @transform_1(%arg0: i32, %arg1: i32) -> (i32, i32) {
    %c0_i32 = arith.constant 0 : i32
    %c0_i32_0 = arith.constant 0 : i32
    return %c0_i32, %arg1 : i32, i32
  }
  func.func @transform_2(%arg0: i32, %arg1: i32) -> (i32, i32) {
    %c0_i32 = arith.constant 0 : i32
    %c0_i32_0 = arith.constant 0 : i32
    return %c0_i32, %arg1 : i32, i32
  }
  func.func @transform_3(%arg0: i32, %arg1: i32) -> (i32, i32) {
    %c0_i32 = arith.constant 0 : i32
    return %arg0, %arg1 : i32, i32
  }
}

</mosaic_0001>

<bundles_post_ra>
// kernel: tpu_custom_call.1
= control target key start
LH: loop header
LB: loop body
LE: loop exit
PB: predicated region body
PF: predicated region fallthrough
CT: control target
= control target key end

     0   :  { %8 = vsyncpa [#allocation3], 0  ;;  %s966_s0 = inlined_call_operand.hbm [shape: f32[18,128], index: 0, kind: input, shape index: {}]   ;;  %s967_s1 = inlined_call_operand.hbm [shape: bf16[128,128], index: 1, kind: input, shape index: {}]   ;;  %s968_s2 = inlined_call_operand.vmem [shape: f32[1,128], index: 2, kind: input, shape index: {}]   ;;  %s969_s3 = inlined_call_operand.hbm [shape: f32[18,128], index: 3, kind: output, shape index: {}]  }
   0x1   :  { %10 = vsyncpa [#allocation3 + $0x1], 0 }
   0x2   :  { %11 = vsyncpa [#allocation6], 0 }
   0x3   :  { %12 = vsyncpa [#allocation4], 0 }
   0x4   :  { %14 = vsyncpa [#allocation4 + $0x1], 0  ;;  %s782_s12 = smov 0   ;;  %s784_s13 = smov 0  }
   0x5   :  { %s786_s14 = smov 0   ;;  %s788_s15 = smov 0  }
   0x6   :  { %s790_s16 = smov 0   ;;  %s792_s17 = smov 0  }
   0x7 LB: > { %s476_s18 = sadd.s32 4294967295, %s753_s17   ;;  %s477_s19 = sadd.s32 4294967294, %s753_s17   ;;  %s753_s17 = sphi %s792_s17, %s20_s17   ;;  %s749_s16 = sphi %s790_s16, %s986_s16   ;;  %s745_s15 = sphi %s788_s15, %s985_s15   ;;  %s741_s14 = sphi %s786_s14, %s984_s14   ;;  %s737_s13 = sphi %s784_s13, %s983_s13   ;;  %s733_s12 = sphi %s782_s12, %s982_s12  }
   0x8   : > { %p52_p0 = scmp.ne.s32.totalorder %s737_s13, %s733_s12  ;;  %p816_p1 = scmp.eq.s32.totalorder %s476_s18, 0 }
   0x9   : > { %p820_p2 = scmp.eq.s32.totalorder %s476_s18, 2  ;;  %p136_p3 = scmp.eq.s32.totalorder %s477_s19, 2 }
   0xa   : > { %p826_p4 = por %p816_p1, %p52_p0  ;;  %p478_p5 = scmp.ge.s32.totalorder %s753_s17, 1 }
   0xb   : > { %p831_p6 = por %p136_p3, %p52_p0  ;;  %p143_p7 = scmp.lt.s32.totalorder %s753_s17, 4 }
   0xc   : > { %s755_s25 = smov [#allocation5]   ;;  %s32_s28 = sadd.s32 1, %s749_s16 }
   0xd   : > { %s974_s23 = scalar_select %p831_p6, 1, 0 }
   0xe   : > { %p836_p8 = pnand %p478_p5, %p143_p7  ;;  %s157_s26 = sshll.u32 %s755_s25, 4  ;;  %s158_s26 = int_to_ptr.vmem [resolvable:$true] %s157_s26 }
   0xf   : > { %s626_s29 = scalar_lea.vmem %s158_s26, 1024  ;;  %p634_p3 = scmp.lt.s32.totalorder %s158_s26, %s158_s26 }
  0x10   : > { %p538_p9 = pneg %p836_p8  ;;  %p627_p12 = scmp.ne.s32.totalorder %s158_s26, %s626_s29 }
  0x11   : > { %p635_p5 = scmp.lt.s32.totalorder %s626_s29, %s626_s29 }
  0x12   : > { %p844_p10 = pnand %p538_p9, %p816_p1 }
  0x13   : > { %p636_p7 = por %p635_p5, %p634_p3 }
  0x14   : > { %p617_p11 = pneg %p844_p10 }
  0x16   : > { %p629_p13 = pnand %p627_p12, %p617_p11 }
  0x18   : > { %p630_p0 = pneg %p629_p13 }
  0x1a   : > { %p637_p6 = pnand %p636_p7, %p630_p0 }
  0x1c   : > { %640 = shalt.err (!%p637_p6)
}
  0x1d   : > { %s756_s30 = smov 64   ;;  %s757_s4 = smov 4  }
  0x1e   : > { %541 = dma.hbm_to_vmem [thread:$0]  (!%p844_p10), %s967_s1, 1024, %s158_s26, [#allocation6], %s756_s30, %s756_s30, %s757_s4  }
  0x1f   : > { %p34_p9 = scmp.ge.s32.totalorder %s32_s28, 3  ;;  %s39_s7 = sadd.s32 1, %s741_s14 }
  0x20   : > { %p46_p6 = scmp.ne.s32.totalorder %s741_s14, %s737_s13  ;;  %p47_p11 = scmp.eq.s32.totalorder %s753_s17, 0 }
  0x21   : > { %s988_s28 = smov (%p34_p9, %s32_s28), 0  ;;  %p551_p0 = scmp.lt.s32.totalorder %s753_s17, 3 }
  0x22   : > { %p862_p12 = por %p47_p11, %p46_p6  ;;  %p868_p13 = por %p820_p2, %p46_p6 }
  0x23   : > { %s36_s10 = ssub.s32 %s749_s16, %s988_s28  ;;  %s177_s11 = sand.u32 1, %s741_s14  }
  0x24   : > { %s978_s9 = scalar_select %p868_p13, 1, 0 }
  0x25   : > { %p37_p10 = scmp.eq.s32.totalorder %s36_s10, 0  ;;  %s482_s18 = sshll.u32 %s177_s11, 3 }
  0x26   : > { %s483_s25 = sshll.u32 %s749_s16, 7  ;;  %s181_s30 = scalar_lea.vmem [#allocation2], %s482_s18 }
  0x27   : > { %s877_s19 = scalar_select %p37_p10, %s741_s14, %s39_s7  }
  0x28   : > { %s186_s29 = scalar_lea.hbm %s966_s0, %s483_s25  ;;  %s188_s4 = sshll.u32 %s181_s30, 4  ;;  %s189_s4 = int_to_ptr.vmem [resolvable:$true] %s188_s4 }
  0x29   : > { %p885_p2 = pnand %p551_p0, %p862_p12  ;;  %s178_s5 = scalar_lea.sflag [#allocation3], %s177_s11 }
  0x2a   : > { %s654_s6 = scalar_lea.vmem %s189_s4, 128  ;;  %s758_s7 = smov [#allocation2]  }
  0x2b   : > { %p643_p3 = pneg %p885_p2  ;;  %p655_p5 = scmp.ne.s32.totalorder %s189_s4, %s654_s6 }
  0x2c   : > { %s659_s10 = sshll.u32 %s758_s7, 4  ;;  %s660_s10 = int_to_ptr.vmem [resolvable:$false] %s659_s10 }
  0x2d   : > { %p657_p7 = pnand %p655_p5, %p643_p3  ;;  %s661_s25 = scalar_lea.vmem %s660_s10, 256 }
  0x2e   : > { %p662_p6 = scmp.lt.s32.totalorder %s189_s4, %s660_s10  ;;  %p663_p11 = scmp.lt.s32.totalorder %s661_s25, %s654_s6 }
  0x2f   : > { %p658_p9 = pneg %p657_p7 }
  0x30   : > { %p664_p10 = por %p663_p11, %p662_p6 }
  0x32   : > { %p665_p13 = pnand %p664_p10, %p658_p9 }
  0x34   : > { %668 = shalt.err (!%p665_p13)
}
  0x35   : > { %545 = dma.hbm_to_vmem [thread:$0]  (!%p885_p2), %s186_s29, 128, %s189_s4, %s178_s5  }
  0x36   : > { %197 = sbr.rel (%p836_p8) target bundleno = 306 (0x132), region = 32  ;;  %s896_s8 = sand.u32 (!%p836_p8), 1, %s737_s13  }
  0x37   : > { %s485_s11 = sshll.u32 (!%p836_p8), %s896_s8, 3  ;;  %s200_s18 = scalar_lea.sflag (!%p836_p8), [#allocation3], %s896_s8 }
  0x38   : > { %s203_s26 = scalar_lea.vmem (!%p836_p8), [#allocation2], %s485_s11 }
  0x3b   : > { %720 = dma.done.wait (%p826_p4), %s200_s18, 128  }
  0x3c   : > { %722 = vsyncadd (%p826_p4), %s200_s18, 4294967168 }
  0x3d   : > { %724 = dma.done.wait (%p816_p1), [#allocation6], 1024  }
  0x3e   : > { %726 = vsyncadd (%p816_p1), [#allocation6], 4294966272  ;;  %v759_v0 = vmov 0.0   ;;  %vm760_vm0 = vmmov 0   ;;  %v607_v1 = vld [vmem:[#allocation5 + $0x38] sm:$0xff]   ;;  %v608_v2 = vld [vmem:[#allocation5 + $0x30] sm:$0xff]  }
  0x3f   : > { %510 = vmatprep.subr.bf16.mxu0 %v759_v0  ;;  %526 = vmatprep.mubr.msk.bf16.mxu0 %vm760_vm0, %v759_v0  ;;  %v609_v3 = vld [vmem:[#allocation5 + $0x28] sm:$0xff]   ;;  %v610_v4 = vld [vmem:[#allocation5 + $0x20] sm:$0xff]   ;;  %v611_v5 = vld [vmem:[#allocation5 + $0x18] sm:$0xff]   ;;  %s498_s24 = sshll.u32 %s745_s15, 7  ;;  %s232_s27 = scalar_lea.vmem [#allocation7], %s485_s11 }
  0x40   : > { %511 = vmatpush3.bf16.msra.mxu0 %v607_v1  ;;  %v612_v6 = vld [vmem:[#allocation5 + $0x10] sm:$0xff]   ;;  %v613_v7 = vld [vmem:[#allocation5 + $0x8] sm:$0xff]   ;;  %v614_v8 = vld [vmem:[#allocation5] sm:$0xff]   ;;  %s372_s29 = sshll.u32 %s232_s27, 4  ;;  %s919_s21 = scalar_lea.hbm %s969_s3, %s498_s24  ;;  %s921_s29 = int_to_ptr.vmem [resolvable:$true] %s372_s29 }
  0x41   : > { %512 = vmatprep.subr.bf16.mxu0 %v759_v0  ;;  %v237_v9 = vld [vmem:[%s203_s26] sm:$0xff]  ;;  %s358_s15 = scalar_lea.sflag [#allocation4], %s896_s8  ;;  %s669_s5 = scalar_lea.vmem %s921_s29, 128 }
  0x42   : > { %v238_v10 = vpack.c.bf16 %v237_v9, %v237_v9  ;;  %v488_v11 = vld [vmem:[%s968_s2] ss:$0 sm:$0xff]  ;;  %p670_p1 = scmp.ne.s32.totalorder %s921_s29, %s669_s5  ;;  %p980_p4 = scmp.ne.s32.totalorder %s978_s9, 0 }
  0x43   : > { %s761_s6 = smov [#allocation7]  }
  0x44   : > { %513 = vmatpush3.bf16.msra.mxu0 %v608_v2  ;;  %p671_p8 = pnand %p670_p1, %p980_p4  ;;  %s673_s7 = sshll.u32 %s761_s6, 4  ;;  %s674_s7 = int_to_ptr.vmem [resolvable:$false] %s673_s7 }
  0x45   : > { %514 = vmatprep.subr.bf16.mxu0 %v759_v0  ;;  %s675_s10 = scalar_lea.vmem %s674_s7, 256  ;;  %p676_p13 = scmp.lt.s32.totalorder %s921_s29, %s674_s7 }
  0x46   : > { %p672_p12 = pneg %p671_p8  ;;  %p677_p0 = scmp.lt.s32.totalorder %s675_s10, %s669_s5 }
  0x48   : > { %515 = vmatpush3.bf16.msra.mxu0 %v609_v3  ;;  %p678_p2 = por %p677_p0, %p676_p13 }
  0x49   : > { %516 = vmatprep.subr.bf16.mxu0 %v759_v0 }
  0x4a   : > { %p679_p3 = pnand %p678_p2, %p672_p12 }
  0x4c   : > { %517 = vmatpush3.bf16.msra.mxu0 %v610_v4 }
  0x4d   : > { %518 = vmatprep.subr.bf16.mxu0 %v759_v0 }
  0x50   : > { %519 = vmatpush3.bf16.msra.mxu0 %v611_v5 }
  0x51   : > { %520 = vmatprep.subr.bf16.mxu0 %v759_v0 }
  0x54   : > { %521 = vmatpush3.bf16.msra.mxu0 %v612_v6 }
  0x55   : > { %522 = vmatprep.subr.bf16.mxu0 %v759_v0 }
  0x58   : > { %523 = vmatpush3.bf16.msra.mxu0 %v613_v7 }
  0x59   : > { %524 = vmatprep.subr.bf16.mxu0 %v759_v0 }
  0x5c   : > { %525 = vmatpush3.bf16.msra.mxu0 %v614_v8 }
  0x5f   : > { %527 = vmatmul.mubr.bf16.vlgmr.msra.gmra.mxu0 %v238_v10 }
 0x11f   : > { %v344_v12 = vpop.f32.mrf.mxu0 }
 0x120   : > { %v345_v13 = vadd.f32 %v488_v11, %v344_v12 }
 0x121   : > { %v528_v14 = vpop.f32.mrf.mxu0 }
 0x122   : > { %v355_v15 = vadd.f32 %v345_v13, %v237_v9 }
 0x123   : > { %v347_v16 = vpop.f32.mrf.mxu0 }
 0x124   : > { %356 = vst [vmem:[%s232_s27] sm:$0xff] %v355_v15 }
 0x125   : > { %v529_v17 = vpop.f32.mrf.mxu0 }
 0x126   : > { %682 = shalt.err (!%p679_p3)
}
 0x127   : > { %s683_s25 = scalar_lea.hbm %s919_s21, 128  ;;  %s687_s18 = scalar_lea.hbm %s969_s3, 384 }
 0x128   : > { %p684_p5 = scmp.ne.s32.totalorder %s919_s21, %s683_s25  ;;  %p688_p6 = scmp.lt.s32.totalorder %s919_s21, %s969_s3 }
 0x129   : > { %p689_p11 = scmp.lt.s32.totalorder %s687_s18, %s683_s25 }
 0x12a   : > { %p685_p7 = pnand %p684_p5, %p980_p4 }
 0x12b   : > { %p690_p10 = por %p689_p11, %p688_p6 }
 0x12c   : > { %p686_p9 = pneg %p685_p7 }
 0x12e   : > { %p691_p1 = pnand %p690_p10, %p686_p9 }
 0x130   : > { %694 = shalt.err (!%p691_p1)
}
 0x131   : > { %536 = dma.vmem_to_hbm [thread:$0]  (%p980_p4), %s921_s29, 128, %s919_s21, %s358_s15  }
 0x132 PF: > { %p553_p8 = scmp.ge.s32.totalorder %s753_s17, 2  ;;  %s384_s22 = sand.u32 1, %s733_s12  }
 0x133   : > { %p981_p12 = scmp.ne.s32.totalorder %s974_s23, 0  ;;  %s385_s24 = scalar_lea.sflag [#allocation4], %s384_s22 }
 0x135   : > { %p547_p13 = pnand %p553_p8, %p981_p12 }
 0x137   : > { %p548_p0 = pneg %p547_p13 }
 0x139   : > { %728 = dma.done.wait (%p548_p0), %s385_s24, 128  }
 0x13a   : > { %730 = vsyncadd (%p548_p0), %s385_s24, 4294967168  ;;  %s20_s17 = sadd.s32 1, %s753_s17   ;;  %s982_s12 = smov %s737_s13 }
 0x13b   : > { %p17_p2 = scmp.ge.s32.totalorder %s20_s17, 5   ;;  %s983_s13 = smov %s741_s14 }
 0x13c   : > { %s984_s14 = smov %s877_s19  ;;  %s985_s15 = smov %s749_s16 }
 0x13d   : > { %s986_s16 = smov %s988_s28  ;;  %19 = sbr.rel (!%p17_p2) target bundleno = 7 (0x7), region = 86 }
 0x142   :  { %390 = vsyncpa [#allocation3], 1 }
 0x143   :  { %392 = vsyncpa [#allocation3 + $0x1], 1 }
 0x144   :  { %393 = vsyncpa [#allocation6], 1 }
 0x145   :  { %394 = vsyncpa [#allocation4], 1 }
 0x146   :  { %396 = vsyncpa [#allocation4 + $0x1], 1 }

// kernel: tpu_custom_call.1
= control target key start
LH: loop header
LB: loop body
LE: loop exit
PB: predicated region body
PF: predicated region fallthrough
CT: control target
= control target key end

     0   :  { %8 = vsyncpa [#allocation3], 0  ;;  %s966_s0 = inlined_call_operand.hbm [shape: f32[18,128], index: 0, kind: input, shape index: {}]   ;;  %s967_s1 = inlined_call_operand.hbm [shape: bf16[128,128], index: 1, kind: input, shape index: {}]   ;;  %s968_s2 = inlined_call_operand.vmem [shape: f32[1,128], index: 2, kind: input, shape index: {}]   ;;  %s969_s3 = inlined_call_operand.hbm [shape: f32[18,128], index: 3, kind: output, shape index: {}]  }
   0x1   :  { %10 = vsyncpa [#allocation3 + $0x1], 0 }
   0x2   :  { %11 = vsyncpa [#allocation6], 0 }
   0x3   :  { %12 = vsyncpa [#allocation4], 0 }
   0x4   :  { %14 = vsyncpa [#allocation4 + $0x1], 0  ;;  %s782_s12 = smov 0   ;;  %s784_s13 = smov 0  }
   0x5   :  { %s786_s14 = smov 0   ;;  %s788_s15 = smov 0  }
   0x6   :  { %s790_s16 = smov 0   ;;  %s792_s17 = smov 0  }
   0x7 LB: > { %s476_s18 = sadd.s32 4294967295, %s753_s17   ;;  %s477_s19 = sadd.s32 4294967294, %s753_s17   ;;  %s753_s17 = sphi %s792_s17, %s20_s17   ;;  %s749_s16 = sphi %s790_s16, %s986_s16   ;;  %s745_s15 = sphi %s788_s15, %s985_s15   ;;  %s741_s14 = sphi %s786_s14, %s984_s14   ;;  %s737_s13 = sphi %s784_s13, %s983_s13   ;;  %s733_s12 = sphi %s782_s12, %s982_s12  }
   0x8   : > { %p52_p0 = scmp.ne.s32.totalorder %s737_s13, %s733_s12  ;;  %p816_p1 = scmp.eq.s32.totalorder %s476_s18, 0 }
   0x9   : > { %p820_p2 = scmp.eq.s32.totalorder %s476_s18, 2  ;;  %p136_p3 = scmp.eq.s32.totalorder %s477_s19, 2 }
   0xa   : > { %p826_p4 = por %p816_p1, %p52_p0  ;;  %p478_p5 = scmp.ge.s32.totalorder %s753_s17, 1 }
   0xb   : > { %p831_p6 = por %p136_p3, %p52_p0  ;;  %p143_p7 = scmp.lt.s32.totalorder %s753_s17, 4 }
   0xc   : > { %s755_s25 = smov [#allocation5]   ;;  %s32_s28 = sadd.s32 1, %s749_s16 }
   0xd   : > { %s974_s23 = scalar_select %p831_p6, 1, 0 }
   0xe   : > { %p836_p8 = pnand %p478_p5, %p143_p7  ;;  %s157_s26 = sshll.u32 %s755_s25, 4  ;;  %s158_s26 = int_to_ptr.vmem [resolvable:$true] %s157_s26 }
   0xf   : > { %s626_s29 = scalar_lea.vmem %s158_s26, 1024  ;;  %p634_p3 = scmp.lt.s32.totalorder %s158_s26, %s158_s26 }
  0x10   : > { %p538_p9 = pneg %p836_p8  ;;  %p627_p12 = scmp.ne.s32.totalorder %s158_s26, %s626_s29 }
  0x11   : > { %p635_p5 = scmp.lt.s32.totalorder %s626_s29, %s626_s29 }
  0x12   : > { %p844_p10 = pnand %p538_p9, %p816_p1 }
  0x13   : > { %p636_p7 = por %p635_p5, %p634_p3 }
  0x14   : > { %p617_p11 = pneg %p844_p10 }
  0x16   : > { %p629_p13 = pnand %p627_p12, %p617_p11 }
  0x18   : > { %p630_p0 = pneg %p629_p13 }
  0x1a   : > { %p637_p6 = pnand %p636_p7, %p630_p0 }
  0x1c   : > { %640 = shalt.err (!%p637_p6)
}
  0x1d   : > { %s756_s30 = smov 64   ;;  %s757_s4 = smov 4  }
  0x1e   : > { %541 = dma.hbm_to_vmem [thread:$0]  (!%p844_p10), %s967_s1, 1024, %s158_s26, [#allocation6], %s756_s30, %s756_s30, %s757_s4  }
  0x1f   : > { %p34_p9 = scmp.ge.s32.totalorder %s32_s28, 3  ;;  %s39_s7 = sadd.s32 1, %s741_s14 }
  0x20   : > { %p46_p6 = scmp.ne.s32.totalorder %s741_s14, %s737_s13  ;;  %p47_p11 = scmp.eq.s32.totalorder %s753_s17, 0 }
  0x21   : > { %s988_s28 = smov (%p34_p9, %s32_s28), 0  ;;  %p551_p0 = scmp.lt.s32.totalorder %s753_s17, 3 }
  0x22   : > { %p862_p12 = por %p47_p11, %p46_p6  ;;  %p868_p13 = por %p820_p2, %p46_p6 }
  0x23   : > { %s36_s10 = ssub.s32 %s749_s16, %s988_s28  ;;  %s177_s11 = sand.u32 1, %s741_s14  }
  0x24   : > { %s978_s9 = scalar_select %p868_p13, 1, 0 }
  0x25   : > { %p37_p10 = scmp.eq.s32.totalorder %s36_s10, 0  ;;  %s482_s18 = sshll.u32 %s177_s11, 3 }
  0x26   : > { %s483_s25 = sshll.u32 %s749_s16, 7  ;;  %s181_s30 = scalar_lea.vmem [#allocation2], %s482_s18 }
  0x27   : > { %s877_s19 = scalar_select %p37_p10, %s741_s14, %s39_s7  }
  0x28   : > { %s186_s29 = scalar_lea.hbm %s966_s0, %s483_s25  ;;  %s188_s4 = sshll.u32 %s181_s30, 4  ;;  %s189_s4 = int_to_ptr.vmem [resolvable:$true] %s188_s4 }
  0x29   : > { %p885_p2 = pnand %p551_p0, %p862_p12  ;;  %s178_s5 = scalar_lea.sflag [#allocation3], %s177_s11 }
  0x2a   : > { %s654_s6 = scalar_lea.vmem %s189_s4, 128  ;;  %s758_s7 = smov [#allocation2]  }
  0x2b   : > { %p643_p3 = pneg %p885_p2  ;;  %p655_p5 = scmp.ne.s32.totalorder %s189_s4, %s654_s6 }
  0x2c   : > { %s659_s10 = sshll.u32 %s758_s7, 4  ;;  %s660_s10 = int_to_ptr.vmem [resolvable:$false] %s659_s10 }
  0x2d   : > { %p657_p7 = pnand %p655_p5, %p643_p3  ;;  %s661_s25 = scalar_lea.vmem %s660_s10, 256 }
  0x2e   : > { %p662_p6 = scmp.lt.s32.totalorder %s189_s4, %s660_s10  ;;  %p663_p11 = scmp.lt.s32.totalorder %s661_s25, %s654_s6 }
  0x2f   : > { %p658_p9 = pneg %p657_p7 }
  0x30   : > { %p664_p10 = por %p663_p11, %p662_p6 }
  0x32   : > { %p665_p13 = pnand %p664_p10, %p658_p9 }
  0x34   : > { %668 = shalt.err (!%p665_p13)
}
  0x35   : > { %545 = dma.hbm_to_vmem [thread:$0]  (!%p885_p2), %s186_s29, 128, %s189_s4, %s178_s5  }
  0x36   : > { %197 = sbr.rel (%p836_p8) target bundleno = 306 (0x132), region = 32  ;;  %s896_s8 = sand.u32 (!%p836_p8), 1, %s737_s13  }
  0x37   : > { %s485_s11 = sshll.u32 (!%p836_p8), %s896_s8, 3  ;;  %s200_s18 = scalar_lea.sflag (!%p836_p8), [#allocation3], %s896_s8 }
  0x38   : > { %s203_s26 = scalar_lea.vmem (!%p836_p8), [#allocation2], %s485_s11 }
  0x3b   : > { %720 = dma.done.wait (%p826_p4), %s200_s18, 128  }
  0x3c   : > { %722 = vsyncadd (%p826_p4), %s200_s18, 4294967168 }
  0x3d   : > { %724 = dma.done.wait (%p816_p1), [#allocation6], 1024  }
  0x3e   : > { %726 = vsyncadd (%p816_p1), [#allocation6], 4294966272  ;;  %v759_v0 = vmov 0.0   ;;  %vm760_vm0 = vmmov 0   ;;  %v607_v1 = vld [vmem:[#allocation5 + $0x38] sm:$0xff]   ;;  %v608_v2 = vld [vmem:[#allocation5 + $0x30] sm:$0xff]  }
  0x3f   : > { %510 = vmatprep.subr.bf16.mxu0 %v759_v0  ;;  %526 = vmatprep.mubr.msk.bf16.mxu0 %vm760_vm0, %v759_v0  ;;  %v609_v3 = vld [vmem:[#allocation5 + $0x28] sm:$0xff]   ;;  %v610_v4 = vld [vmem:[#allocation5 + $0x20] sm:$0xff]   ;;  %v611_v5 = vld [vmem:[#allocation5 + $0x18] sm:$0xff]   ;;  %s498_s24 = sshll.u32 %s745_s15, 7  ;;  %s232_s27 = scalar_lea.vmem [#allocation7], %s485_s11 }
  0x40   : > { %511 = vmatpush3.bf16.msra.mxu0 %v607_v1  ;;  %v612_v6 = vld [vmem:[#allocation5 + $0x10] sm:$0xff]   ;;  %v613_v7 = vld [vmem:[#allocation5 + $0x8] sm:$0xff]   ;;  %v614_v8 = vld [vmem:[#allocation5] sm:$0xff]   ;;  %s372_s29 = sshll.u32 %s232_s27, 4  ;;  %s919_s21 = scalar_lea.hbm %s969_s3, %s498_s24  ;;  %s921_s29 = int_to_ptr.vmem [resolvable:$true] %s372_s29 }
  0x41   : > { %512 = vmatprep.subr.bf16.mxu0 %v759_v0  ;;  %v237_v9 = vld [vmem:[%s203_s26] sm:$0xff]  ;;  %s358_s15 = scalar_lea.sflag [#allocation4], %s896_s8  ;;  %s669_s5 = scalar_lea.vmem %s921_s29, 128 }
  0x42   : > { %v238_v10 = vpack.c.bf16 %v237_v9, %v237_v9  ;;  %v488_v11 = vld [vmem:[%s968_s2] ss:$0 sm:$0xff]  ;;  %p670_p1 = scmp.ne.s32.totalorder %s921_s29, %s669_s5  ;;  %p980_p4 = scmp.ne.s32.totalorder %s978_s9, 0 }
  0x43   : > { %s761_s6 = smov [#allocation7]  }
  0x44   : > { %513 = vmatpush3.bf16.msra.mxu0 %v608_v2  ;;  %p671_p8 = pnand %p670_p1, %p980_p4  ;;  %s673_s7 = sshll.u32 %s761_s6, 4  ;;  %s674_s7 = int_to_ptr.vmem [resolvable:$false] %s673_s7 }
  0x45   : > { %514 = vmatprep.subr.bf16.mxu0 %v759_v0  ;;  %s675_s10 = scalar_lea.vmem %s674_s7, 256  ;;  %p676_p13 = scmp.lt.s32.totalorder %s921_s29, %s674_s7 }
  0x46   : > { %p672_p12 = pneg %p671_p8  ;;  %p677_p0 = scmp.lt.s32.totalorder %s675_s10, %s669_s5 }
  0x48   : > { %515 = vmatpush3.bf16.msra.mxu0 %v609_v3  ;;  %p678_p2 = por %p677_p0, %p676_p13 }
  0x49   : > { %516 = vmatprep.subr.bf16.mxu0 %v759_v0 }
  0x4a   : > { %p679_p3 = pnand %p678_p2, %p672_p12 }
  0x4c   : > { %517 = vmatpush3.bf16.msra.mxu0 %v610_v4 }
  0x4d   : > { %518 = vmatprep.subr.bf16.mxu0 %v759_v0 }
  0x50   : > { %519 = vmatpush3.bf16.msra.mxu0 %v611_v5 }
  0x51   : > { %520 = vmatprep.subr.bf16.mxu0 %v759_v0 }
  0x54   : > { %521 = vmatpush3.bf16.msra.mxu0 %v612_v6 }
  0x55   : > { %522 = vmatprep.subr.bf16.mxu0 %v759_v0 }
  0x58   : > { %523 = vmatpush3.bf16.msra.mxu0 %v613_v7 }
  0x59   : > { %524 = vmatprep.subr.bf16.mxu0 %v759_v0 }
  0x5c   : > { %525 = vmatpush3.bf16.msra.mxu0 %v614_v8 }
  0x5f   : > { %527 = vmatmul.mubr.bf16.vlgmr.msra.gmra.mxu0 %v238_v10 }
 0x11f   : > { %v344_v12 = vpop.f32.mrf.mxu0 }
 0x120   : > { %v345_v13 = vadd.f32 %v488_v11, %v344_v12 }
 0x121   : > { %v528_v14 = vpop.f32.mrf.mxu0 }
 0x122   : > { %v355_v15 = vadd.f32 %v345_v13, %v237_v9 }
 0x123   : > { %v347_v16 = vpop.f32.mrf.mxu0 }
 0x124   : > { %356 = vst [vmem:[%s232_s27] sm:$0xff] %v355_v15 }
 0x125   : > { %v529_v17 = vpop.f32.mrf.mxu0 }
 0x126   : > { %682 = shalt.err (!%p679_p3)
}
 0x127   : > { %s683_s25 = scalar_lea.hbm %s919_s21, 128  ;;  %s687_s18 = scalar_lea.hbm %s969_s3, 384 }
 0x128   : > { %p684_p5 = scmp.ne.s32.totalorder %s919_s21, %s683_s25  ;;  %p688_p6 = scmp.lt.s32.totalorder %s919_s21, %s969_s3 }
 0x129   : > { %p689_p11 = scmp.lt.s32.totalorder %s687_s18, %s683_s25 }
 0x12a   : > { %p685_p7 = pnand %p684_p5, %p980_p4 }
 0x12b   : > { %p690_p10 = por %p689_p11, %p688_p6 }
 0x12c   : > { %p686_p9 = pneg %p685_p7 }
 0x12e   : > { %p691_p1 = pnand %p690_p10, %p686_p9 }
 0x130   : > { %694 = shalt.err (!%p691_p1)
}
 0x131   : > { %536 = dma.vmem_to_hbm [thread:$0]  (%p980_p4), %s921_s29, 128, %s919_s21, %s358_s15  }
 0x132 PF: > { %p553_p8 = scmp.ge.s32.totalorder %s753_s17, 2  ;;  %s384_s22 = sand.u32 1, %s733_s12  }
 0x133   : > { %p981_p12 = scmp.ne.s32.totalorder %s974_s23, 0  ;;  %s385_s24 = scalar_lea.sflag [#allocation4], %s384_s22 }
 0x135   : > { %p547_p13 = pnand %p553_p8, %p981_p12 }
 0x137   : > { %p548_p0 = pneg %p547_p13 }
 0x139   : > { %728 = dma.done.wait (%p548_p0), %s385_s24, 128  }
 0x13a   : > { %730 = vsyncadd (%p548_p0), %s385_s24, 4294967168  ;;  %s20_s17 = sadd.s32 1, %s753_s17   ;;  %s982_s12 = smov %s737_s13 }
 0x13b   : > { %p17_p2 = scmp.ge.s32.totalorder %s20_s17, 5   ;;  %s983_s13 = smov %s741_s14 }
 0x13c   : > { %s984_s14 = smov %s877_s19  ;;  %s985_s15 = smov %s749_s16 }
 0x13d   : > { %s986_s16 = smov %s988_s28  ;;  %19 = sbr.rel (!%p17_p2) target bundleno = 7 (0x7), region = 86 }
 0x142   :  { %390 = vsyncpa [#allocation3], 1 }
 0x143   :  { %392 = vsyncpa [#allocation3 + $0x1], 1 }
 0x144   :  { %393 = vsyncpa [#allocation6], 1 }
 0x145   :  { %394 = vsyncpa [#allocation4], 1 }
 0x146   :  { %396 = vsyncpa [#allocation4 + $0x1], 1 }

</bundles_post_ra>
